<compile_context>
chip_gen: v7x
topology: tpu7x:2x2x1
jax: 0.10.0
libtpu: 0.0.40
codegen_flags: <defaults>
</compile_context>

<pallas_src>
import jax
import jax.numpy as jnp
from jax.experimental import pallas as pl
from jax.experimental.pallas import tpu as pltpu


# ----------------------------------------------------------------------------
# Pallas kernel
# ----------------------------------------------------------------------------

def _pos_enc_kernel(alpha_ref, x_ref, pos_ref, o_ref):
    # alpha_ref: SMEM (1,) f32 scalar
    # x_ref:     VMEM (tile_b, tile_t, D)
    # pos_ref:   VMEM (tile_t, D)   -- broadcast over batch in-register
    alpha = alpha_ref[0]
    o_ref[...] = (x_ref[...] + alpha * pos_ref[...]).astype(o_ref.dtype)


# ----------------------------------------------------------------------------
# Tile-size heuristics (VMEM-budgeted, dtype-aware)
# ----------------------------------------------------------------------------

def _sublane_multiple(itemsize):
    # Sublane packing: 8 rows for 4-byte, 16 for 2-byte, 32 for 1-byte dtypes.
    return {4: 8, 2: 16, 1: 32}.get(itemsize, 8)


def _choose_tile_t(T, D, itemsize, target_block_bytes):
    """Largest sublane-aligned divisor of T whose (1, tile_t, D) slab fits budget."""
    sub = _sublane_multiple(itemsize)
    if T % sub != 0:
        # Ragged sequence length: fall back to full-extent blocks (always legal).
        return T, True
    row_bytes = D * itemsize
    max_rows = max(sub, min(T, target_block_bytes // max(row_bytes, 1)))
    best = sub
    t = sub
    while t <= T:
        if T % t == 0 and t <= max_rows:
            best = t
        t += sub
    return best, False


def _choose_tile_b(B, tile_t, D, itemsize, target_block_bytes):
    """Largest divisor of B keeping the (tile_b, tile_t, D) x block under budget."""
    slab_bytes = tile_t * D * itemsize
    max_b = max(1, target_block_bytes // max(slab_bytes, 1))
    best = 1
    for b in range(1, B + 1):
        if B % b == 0 and b <= max_b:
            best = b
    return best


# ----------------------------------------------------------------------------
# Wrapper
# ----------------------------------------------------------------------------

def positional_encoding(x, pos_table, alpha, *, target_block_bytes=2 << 20):
    """x: [B, T, D], pos_table: [n_position, D] f32, alpha: scalar/(1,) f32.

    Double-buffered VMEM footprint ~= 4 * target_block_bytes + 2 * pos_block,
    kept well under the scoped-VMEM default on every TPU generation
    (v5e 16 MiB / v6e 32 MiB / v7x 32 MiB).
    """
    B, T, D = x.shape
    P, Dp = pos_table.shape
    assert P >= T and Dp == D, "pos_table must cover the sequence length"

    itemsize = jnp.dtype(x.dtype).itemsize

    tile_t, ragged = _choose_tile_t(T, D, itemsize, target_block_bytes)
    # Only materialize a host-side slice in the ragged fallback; otherwise the
    # BlockSpec index_map picks the first T rows straight out of the full table.
    pos = pos_table[:T] if ragged else pos_table
    tile_b = _choose_tile_b(B, tile_t, D, itemsize, target_block_bytes)

    n_t = T // tile_t
    n_b = B // tile_b

    alpha_s = jnp.asarray(alpha, jnp.float32).reshape((1,))

    cost = pl.CostEstimate(
        flops=2 * B * T * D,                      # one mul + one add per element
        transcendentals=0,
        bytes_accessed=2 * B * T * D * itemsize   # read x + write out
        + T * D * jnp.dtype(pos.dtype).itemsize,  # read pos once
    )

    return pl.pallas_call(
        _pos_enc_kernel,
        out_shape=jax.ShapeDtypeStruct((B, T, D), x.dtype),
        # t is the OUTER (slowest) grid axis: the pos block index only changes
        # when t changes, so inner b steps reuse the already-resident pos tile.
        grid=(n_t, n_b),
        in_specs=[
            pl.BlockSpec(memory_space=pltpu.MemorySpace.SMEM),           # alpha
            pl.BlockSpec((tile_b, tile_t, D), lambda t, b: (b, t, 0)),   # x
            pl.BlockSpec((tile_t, D), lambda t, b: (t, 0)),              # pos rows
        ],
        out_specs=pl.BlockSpec((tile_b, tile_t, D), lambda t, b: (b, t, 0)),
        compiler_params=pltpu.CompilerParams(
            dimension_semantics=("parallel", "parallel"),
            vmem_limit_bytes=32 << 20,
        ),
        cost_estimate=cost,
    )(alpha_s, x, pos)


# ----------------------------------------------------------------------------
# Sinusoid table (matches PositionalEncoding._get_sinusoid_encoding_table)
# ----------------------------------------------------------------------------

def sinusoid_encoding_table(n_position, d_hid):
    position = jnp.arange(n_position, dtype=jnp.float32)[:, None]          # [P, 1]
    hid = jnp.arange(d_hid)
    exponent = (2.0 * (hid // 2).astype(jnp.float32)) / float(d_hid)       # 2*(j//2)/d_hid
    inv_freq = jnp.power(jnp.float32(10000.0), -exponent)[None, :]         # [1, D]
    angle = position * inv_freq                                            # [P, D]
    even = (hid % 2 == 0)[None, :]
    return jnp.where(even, jnp.sin(angle), jnp.cos(angle)).astype(jnp.float32)


# ----------------------------------------------------------------------------
# Main
# ----------------------------------------------------------------------------

if __name__ == "__main__":
    # Small shapes consistent with the module; D = 128 keeps the lane axis dense.
    B, T, D_HID, N_POSITION = 2, 16, 128, 32

    key = jax.random.PRNGKey(0)
    x = jax.random.normal(key, (B, T, D_HID), jnp.float32)

    pos_table = sinusoid_encoding_table(N_POSITION, D_HID)
    alpha = jnp.ones((1,), jnp.float32)   # nn.Parameter(torch.ones(1)) at init

    out = positional_encoding(x, pos_table, alpha)
    out = jax.block_until_ready(out)

    # Pure-JAX reference of the module forward.
    ref = x + alpha[0] * pos_table[None, :T, :]

    assert out.shape == (B, T, D_HID)
    assert bool(jnp.all(jnp.isfinite(out)))
    assert bool(jnp.allclose(out, ref, atol=1e-6, rtol=1e-6))
    print("KERNEL_OK")
</pallas_src>

<mosaic_0001>
module attributes {stable_mosaic.version = 11 : i64} {
  func.func @_pos_enc_kernel(%arg0: i32, %arg1: i32, %arg2: memref<1xf32, #tpu.memory_space<smem>>, %arg3: memref<2x16x128xf32, #tpu.memory_space<vmem>>, %arg4: memref<16x128xf32, #tpu.memory_space<vmem>>, %arg5: memref<2x16x128xf32, #tpu.memory_space<vmem>>) attributes {dimension_semantics = [#tpu.dimension_semantics<parallel>, #tpu.dimension_semantics<parallel>], iteration_bounds = array<i64: 1, 1>, scalar_prefetch = 0 : i64, scratch_operands = 0 : i64, tpu.core_type = #tpu.core_type<tc>, window_params = [{transform_indices = @transform_0, window_bounds = array<i64: 1>}, {transform_indices = @transform_1, window_bounds = array<i64: 2, 16, 128>}, {transform_indices = @transform_2, window_bounds = array<i64: 16, 128>}, {transform_indices = @transform_3, window_bounds = array<i64: 2, 16, 128>}]} {
    %c0 = arith.constant 0 : index
    %0 = memref.load %arg2[%c0] : memref<1xf32, #tpu.memory_space<smem>>
    %c0_0 = arith.constant 0 : index
    %c0_1 = arith.constant 0 : index
    %c0_2 = arith.constant 0 : index
    %1 = vector.load %arg3[%c0_0, %c0_1, %c0_2] : memref<2x16x128xf32, #tpu.memory_space<vmem>>, vector<2x16x128xf32>
    %c0_3 = arith.constant 0 : index
    %c0_4 = arith.constant 0 : index
    %2 = vector.load %arg4[%c0_3, %c0_4] : memref<16x128xf32, #tpu.memory_space<vmem>>, vector<16x128xf32>
    %3 = vector.broadcast %0 : f32 to vector<16x128xf32>
    %4 = arith.mulf %3, %2 : vector<16x128xf32>
    %5 = vector.shape_cast %4 : vector<16x128xf32> to vector<1x16x128xf32>
    %6 = vector.broadcast %5 : vector<1x16x128xf32> to vector<2x16x128xf32>
    %7 = arith.addf %1, %6 : vector<2x16x128xf32>
    %c0_5 = arith.constant 0 : index
    %c0_6 = arith.constant 0 : index
    %c0_7 = arith.constant 0 : index
    %8 = vector.load %arg5[%c0_5, %c0_6, %c0_7] : memref<2x16x128xf32, #tpu.memory_space<vmem>>, vector<2x16x128xf32>
    tpu.vector_store %arg5[%c0_5, %c0_6, %c0_7], %7 {strides = array<i32>} : memref<2x16x128xf32, #tpu.memory_space<vmem>>, vector<2x16x128xf32>,
    return
  }
  func.func @transform_0(%arg0: i32, %arg1: i32) -> i32 {
    %c0_i32 = arith.constant 0 : i32
    %c0_i32_0 = arith.constant 0 : i32
    return %c0_i32 : i32
  }
  func.func @transform_1(%arg0: i32, %arg1: i32) -> (i32, i32, i32) {
    %c0_i32 = arith.constant 0 : i32
    %c0_i32_0 = arith.constant 0 : i32
    return %arg1, %arg0, %c0_i32 : i32, i32, i32
  }
  func.func @transform_2(%arg0: i32, %arg1: i32) -> (i32, i32) {
    %c0_i32 = arith.constant 0 : i32
    %c0_i32_0 = arith.constant 0 : i32
    return %arg0, %c0_i32 : i32, i32
  }
  func.func @transform_3(%arg0: i32, %arg1: i32) -> (i32, i32, i32) {
    %c0_i32 = arith.constant 0 : i32
    %c0_i32_0 = arith.constant 0 : i32
    return %arg1, %arg0, %c0_i32 : i32, i32, i32
  }
}

</mosaic_0001>

<bundles_post_ra>
// kernel: tpu_custom_call.1
= control target key start
LH: loop header
LB: loop body
LE: loop exit
PB: predicated region body
PF: predicated region fallthrough
CT: control target
= control target key end

     0   :  { %9 = vsyncpa [#allocation4], 0  ;;  %s233_s0 = inlined_call_operand.<no memory space> [shape: f32[1], index: 0, kind: input, shape index: {}]   ;;  %s234_s1 = inlined_call_operand.hbm [shape: f32[2,16,128], index: 1, kind: input, shape index: {}]   ;;  %s235_s2 = inlined_call_operand.hbm [shape: f32[32,128], index: 2, kind: input, shape index: {}]   ;;  %s236_s3 = inlined_call_operand.hbm [shape: f32[2,16,128], index: 3, kind: output, shape index: {}]  }
   0x1   :  { %10 = vsyncpa [#allocation7], 0 }
   0x2   :  { %11 = vsyncpa [#allocation5], 0  ;;  %s157_s12 = smov [#allocation3]   ;;  %s85_s16 = scalar_lea.hbm %s234_s1, 512 }
   0x3   :  { %s19_s13 = sshll.u32 %s157_s12, 4  ;;  %p86_p0 = scmp.ne.s32.totalorder %s234_s1, %s85_s16  ;;  %s20_s13 = int_to_ptr.vmem [resolvable:$true] %s19_s13 }
   0x4   :  { %p89_p1 = scmp.lt.u32.totalorder %s85_s16, %s234_s1 }
   0x6   :  { %p91_p2 = pnand %p89_p1, %p86_p0 }
   0x8   :  { %94 = shalt.err (!%p91_p2)
}
   0x9   :  { %s95_s21 = scalar_lea.vmem %s20_s13, 512  ;;  %p100_p4 = scmp.lt.s32.totalorder %s20_s13, %s20_s13 }
   0xa   :  { %p96_p3 = scmp.ne.s32.totalorder %s20_s13, %s95_s21  ;;  %p101_p5 = scmp.lt.s32.totalorder %s95_s21, %s95_s21 }
   0xc   :  { %p102_p6 = por %p101_p5, %p100_p4 }
   0xe   :  { %p103_p7 = pnand %p102_p6, %p96_p3 }
  0x10   :  { %106 = shalt.err (!%p103_p7)
}
  0x11   :  { %s158_s22 = smov 128   ;;  %s159_s23 = smov 8  }
  0x12   :  { %25 = dma.hbm_to_vmem [thread:$0]  %s234_s1, 512, %s20_s13, [#allocation4], %s158_s22, %s158_s22, %s159_s23  }
  0x13   :  { %s160_s26 = smov [#allocation6]   ;;  %s107_s30 = scalar_lea.hbm %s235_s2, 256 }
  0x14   :  { %s31_s27 = sshll.u32 %s160_s26, 4  ;;  %p108_p8 = scmp.ne.s32.totalorder %s235_s2, %s107_s30  ;;  %s32_s27 = int_to_ptr.vmem [resolvable:$true] %s31_s27 }
  0x15   :  { %s109_s8 = scalar_lea.hbm %s235_s2, 512  ;;  %p111_p10 = scmp.lt.u32.totalorder %s107_s30, %s235_s2 }
  0x16   :  { %p110_p9 = scmp.lt.u32.totalorder %s109_s8, %s107_s30 }
  0x18   :  { %p112_p11 = por %p111_p10, %p110_p9 }
  0x1a   :  { %p113_p12 = pnand %p112_p11, %p108_p8 }
  0x1c   :  { %116 = shalt.err (!%p113_p12)
}
  0x1d   :  { %s117_s1 = scalar_lea.vmem %s32_s27, 256  ;;  %p122_p0 = scmp.lt.s32.totalorder %s32_s27, %s32_s27 }
  0x1e   :  { %p118_p13 = scmp.ne.s32.totalorder %s32_s27, %s117_s1  ;;  %p123_p1 = scmp.lt.s32.totalorder %s117_s1, %s117_s1 }
  0x20   :  { %p124_p2 = por %p123_p1, %p122_p0 }
  0x22   :  { %p125_p3 = pnand %p124_p2, %p118_p13 }
  0x24   :  { %128 = shalt.err (!%p125_p3)
}
  0x25   :  { %37 = dma.hbm_to_vmem [thread:$0]  %s235_s2, 256, %s32_s27, [#allocation7], %s158_s22, %s158_s22, %s159_s23  }
  0x26   :  { %151 = dma.done.wait [#allocation4], 512  }
  0x27   :  { %152 = vsyncadd [#allocation4], 4294966784 }
  0x28   :  { %153 = dma.done.wait [#allocation7], 256  }
  0x29   :  { %154 = vsyncadd [#allocation7], 4294967040  ;;  %v51_v0 = vstv %s233_s0  ;;  %v45_v1 = vld [vmem:[#allocation3] sm:$0xff]  ;;  %v46_v3 = vld [vmem:[#allocation3 + $0x8] sm:$0xff]  ;;  %s161_s15 = smov [#allocation8]  }
  0x2a   :  { %v49_v2 = vld [vmem:[#allocation6] sm:$0xff]  ;;  %v50_v5 = vld [vmem:[#allocation6 + $0x8] sm:$0xff]  ;;  %v47_v6 = vld [vmem:[#allocation3 + $0x10] sm:$0xff]  ;;  %s67_s16 = sshll.u32 %s161_s15, 4  ;;  %s68_s16 = int_to_ptr.vmem [resolvable:$true] %s67_s16 }
  0x2b   :  { %v52_v4 = vmul.f32 %v51_v0, %v49_v2  ;;  %v48_v7 = vld [vmem:[#allocation3 + $0x18] sm:$0xff]  ;;  %v53_v8 = vmul.f32 %v51_v0, %v50_v5  ;;  %s129_s0 = scalar_lea.vmem %s68_s16, 512  ;;  %p134_p5 = scmp.lt.s32.totalorder %s68_s16, %s68_s16 }
  0x2c   :  { %p130_p4 = scmp.ne.s32.totalorder %s68_s16, %s129_s0  ;;  %p135_p6 = scmp.lt.s32.totalorder %s129_s0, %s129_s0 }
  0x2d   :  { %v54_v9 = vadd.f32 %v52_v4, %v45_v1  ;;  %v56_v10 = vadd.f32 %v52_v4, %v47_v6  ;;  %v55_v11 = vadd.f32 %v53_v8, %v46_v3  ;;  %v57_v12 = vadd.f32 %v53_v8, %v48_v7 }
  0x2e   :  { %p136_p7 = por %p135_p6, %p134_p5 }
  0x2f   :  { %58 = vst [vmem:[#allocation8] sm:$0xff] %v54_v9  ;;  %60 = vst [vmem:[#allocation8 + $0x10] sm:$0xff] %v56_v10 }
  0x30   :  { %59 = vst [vmem:[#allocation8 + $0x8] sm:$0xff] %v55_v11  ;;  %61 = vst [vmem:[#allocation8 + $0x18] sm:$0xff] %v57_v12  ;;  %p137_p8 = pnand %p136_p7, %p130_p4 }
  0x32   :  { %140 = shalt.err (!%p137_p8)
}
  0x33   :  { %s141_s18 = scalar_lea.hbm %s236_s3, 512 }
  0x34   :  { %p142_p9 = scmp.ne.s32.totalorder %s236_s3, %s141_s18  ;;  %p145_p10 = scmp.lt.u32.totalorder %s141_s18, %s236_s3 }
  0x36   :  { %p147_p11 = pnand %p145_p10, %p142_p9 }
  0x38   :  { %150 = shalt.err (!%p147_p11)
}
  0x39   :  { %73 = dma.vmem_to_hbm [thread:$0]  %s68_s16, 512, %s236_s3, [#allocation5], %s158_s22, %s158_s22, %s159_s23  }
  0x3a   :  { %155 = dma.done.wait [#allocation5], 512  }
  0x3b   :  { %156 = vsyncadd [#allocation5], 4294966784 }
  0x3c   :  { %77 = vsyncpa [#allocation4], 1 }
  0x3d   :  { %78 = vsyncpa [#allocation7], 1 }
  0x3e   :  { %79 = vsyncpa [#allocation5], 1 }

</bundles_post_ra>
